<compile_context>
chip_gen: v5e
topology: v5e:2x2
jax: 0.10.0
libtpu: 0.0.40
codegen_flags: <defaults>
</compile_context>

<pallas_src>
import functools

import jax
import jax.numpy as jnp
from jax.experimental import pallas as pl
from jax.experimental.pallas import tpu as pltpu

PACK = 8                 # original rows packed per lane-row
DEFAULT_TILE_B = 2048    # original rows per grid step (multiple of 64)


def _round_up(n, m):
    return ((n + m - 1) // m) * m


def _block_diag(w, n):
    """(din, dout) -> (n*din, n*dout) block-diagonal matrix with n copies of w."""
    din, dout = w.shape
    out = jnp.zeros((n * din, n * dout), w.dtype)
    for i in range(n):
        out = out.at[i * din:(i + 1) * din, i * dout:(i + 1) * dout].set(w)
    return out


def _mlp_kernel(x_ref, w1_ref, b1_ref, w2_ref, b2_ref, w3_ref, b3_ref, o_ref):
    # layer1 + ReLU
    h1 = jnp.dot(x_ref[...], w1_ref[...], preferred_element_type=jnp.float32)
    h1 = jnp.maximum(h1 + b1_ref[...], 0.0)
    # layer2 + ReLU
    h2 = jnp.dot(h1, w2_ref[...], preferred_element_type=jnp.float32)
    h2 = jnp.maximum(h2 + b2_ref[...], 0.0)
    # layer3 + sigmoid
    z = jnp.dot(h2, w3_ref[...], preferred_element_type=jnp.float32) + b3_ref[...]
    o_ref[...] = jax.nn.sigmoid(z).astype(o_ref.dtype)


@functools.partial(jax.jit, static_argnames=("tile_b",))
def anomaly_detection_forward(x, params, *, tile_b=DEFAULT_TILE_B):
    """x: (B, input_dim) float32. params: dict of w1,b1,w2,b2,w3,b3 (weights stored (D_in, D_out))."""
    B, D = x.shape

    # Effective tile: multiple of 64 original rows, no bigger than needed.
    tb = max(64, min(_round_up(tile_b, 64), _round_up(B, 64)))
    B_pad = _round_up(B, tb)
    if B_pad != B:
        x = jnp.pad(x, ((0, B_pad - B), (0, 0)))

    # Lane-dense packing: PACK original rows per packed row (contiguous reshape).
    xp = x.reshape(B_pad // PACK, PACK * D)

    # Block-diagonal weights / tiled biases so the packed layout computes the
    # same per-row MLP.
    w1 = _block_diag(params["w1"], PACK)
    w2 = _block_diag(params["w2"], PACK)
    w3 = _block_diag(params["w3"], PACK)
    b1 = jnp.tile(params["b1"], (1, PACK))
    b2 = jnp.tile(params["b2"], (1, PACK))
    b3 = jnp.tile(params["b3"], (1, PACK))

    tp = tb // PACK                      # packed rows per grid step
    grid = (B_pad // tb,)

    def resident(a):                     # stays VMEM-resident across all grid steps
        return pl.BlockSpec(a.shape, lambda i: (0, 0))

    out = pl.pallas_call(
        _mlp_kernel,
        out_shape=jax.ShapeDtypeStruct((B_pad // PACK, PACK), jnp.float32),
        grid=grid,
        in_specs=[
            pl.BlockSpec((tp, PACK * D), lambda i: (i, 0)),   # streamed x tiles
            resident(w1), resident(b1),
            resident(w2), resident(b2),
            resident(w3), resident(b3),
        ],
        out_specs=pl.BlockSpec((tp, PACK), lambda i: (i, 0)),
        compiler_params=pltpu.CompilerParams(
            dimension_semantics=("parallel",)),
    )(xp, w1, b1, w2, b2, w3, b3)

    # Unpack: element [r, j] of the packed output is original row r*PACK + j.
    return out.reshape(B_pad, 1)[:B]


def init_params(key, input_dim):
    """Deterministic init mimicking nn.Linear shapes (weights stored transposed)."""
    k1, k2, k3, k4, k5, k6 = jax.random.split(key, 6)

    def uniform(k, shape, fan_in):
        bound = 1.0 / jnp.sqrt(fan_in)
        return jax.random.uniform(k, shape, jnp.float32, -bound, bound)

    return {
        "w1": uniform(k1, (input_dim, 64), input_dim),
        "b1": uniform(k2, (1, 64), input_dim),
        "w2": uniform(k3, (64, 32), 64),
        "b2": uniform(k4, (1, 32), 64),
        "w3": uniform(k5, (32, 1), 32),
        "b3": uniform(k6, (1, 1), 32),
    }


def _reference_forward(x, p):
    h1 = jnp.maximum(x @ p["w1"] + p["b1"], 0.0)
    h2 = jnp.maximum(h1 @ p["w2"] + p["b2"], 0.0)
    return jax.nn.sigmoid(h2 @ p["w3"] + p["b3"])


if __name__ == "__main__":
    key = jax.random.PRNGKey(0)
    kx, kp = jax.random.split(key)

    batch, input_dim = 8, 16
    x = jax.random.normal(kx, (batch, input_dim), dtype=jnp.float32)
    params = init_params(kp, input_dim)

    out = jax.block_until_ready(anomaly_detection_forward(x, params))
    ref = _reference_forward(x, params)
    assert out.shape == (batch, 1)
    assert jnp.allclose(out, ref, atol=2e-5, rtol=2e-5)

    # Larger, non-multiple batch exercises the multi-step grid + padding path.
    batch2 = 4100
    x2 = jax.random.normal(kx, (batch2, input_dim), dtype=jnp.float32)
    out2 = jax.block_until_ready(anomaly_detection_forward(x2, params))
    ref2 = _reference_forward(x2, params)
    assert out2.shape == (batch2, 1)
    assert jnp.allclose(out2, ref2, atol=2e-5, rtol=2e-5)

    print("KERNEL_OK")
</pallas_src>

<mosaic_0001>
module attributes {stable_mosaic.version = 11 : i64} {
  func.func @_mlp_kernel(%arg0: i32, %arg1: memref<8x128xf32, #tpu.memory_space<vmem>>, %arg2: memref<128x512xf32, #tpu.memory_space<vmem>>, %arg3: memref<1x512xf32, #tpu.memory_space<vmem>>, %arg4: memref<512x256xf32, #tpu.memory_space<vmem>>, %arg5: memref<1x256xf32, #tpu.memory_space<vmem>>, %arg6: memref<256x8xf32, #tpu.memory_space<vmem>>, %arg7: memref<1x8xf32, #tpu.memory_space<vmem>>, %arg8: memref<8x8xf32, #tpu.memory_space<vmem>>) attributes {dimension_semantics = [#tpu.dimension_semantics<parallel>], iteration_bounds = array<i64: 1>, scalar_prefetch = 0 : i64, scratch_operands = 0 : i64, tpu.core_type = #tpu.core_type<tc>, window_params = [{transform_indices = @transform_0, window_bounds = array<i64: 8, 128>}, {pipeline_mode = #tpu.pipeline_mode<synchronous>, transform_indices = @transform_1, window_bounds = array<i64: 128, 512>}, {pipeline_mode = #tpu.pipeline_mode<synchronous>, transform_indices = @transform_2, window_bounds = array<i64: 1, 512>}, {pipeline_mode = #tpu.pipeline_mode<synchronous>, transform_indices = @transform_3, window_bounds = array<i64: 512, 256>}, {pipeline_mode = #tpu.pipeline_mode<synchronous>, transform_indices = @transform_4, window_bounds = array<i64: 1, 256>}, {pipeline_mode = #tpu.pipeline_mode<synchronous>, transform_indices = @transform_5, window_bounds = array<i64: 256, 8>}, {pipeline_mode = #tpu.pipeline_mode<synchronous>, transform_indices = @transform_6, window_bounds = array<i64: 1, 8>}, {transform_indices = @transform_7, window_bounds = array<i64: 8, 8>}]} {
    %c0 = arith.constant 0 : index
    %c0_0 = arith.constant 0 : index
    %0 = vector.load %arg1[%c0, %c0_0] : memref<8x128xf32, #tpu.memory_space<vmem>>, vector<8x128xf32>
    %c0_1 = arith.constant 0 : index
    %c0_2 = arith.constant 0 : index
    %1 = vector.load %arg2[%c0_1, %c0_2] : memref<128x512xf32, #tpu.memory_space<vmem>>, vector<128x512xf32>
    %cst = arith.constant dense<0.000000e+00> : vector<8x512xf32>
    %2 = tpu.matmul %0, %1, %cst {dimension_numbers = #tpu.dot_dimension_numbers<[1], [0], [0], [1], [0, 0, 1, 1], [], []>} : vector<8x128xf32>, vector<128x512xf32>, vector<8x512xf32> -> vector<8x512xf32>
    %c0_3 = arith.constant 0 : index
    %c0_4 = arith.constant 0 : index
    %3 = vector.load %arg3[%c0_3, %c0_4] : memref<1x512xf32, #tpu.memory_space<vmem>>, vector<1x512xf32>
    %4 = vector.broadcast %3 : vector<1x512xf32> to vector<8x512xf32>
    %5 = arith.addf %2, %4 : vector<8x512xf32>
    %cst_5 = arith.constant 0.000000e+00 : f32
    %6 = vector.broadcast %cst_5 : f32 to vector<8x512xf32>
    %7 = arith.maximumf %5, %6 : vector<8x512xf32>
    %c0_6 = arith.constant 0 : index
    %c0_7 = arith.constant 0 : index
    %8 = vector.load %arg4[%c0_6, %c0_7] : memref<512x256xf32, #tpu.memory_space<vmem>>, vector<512x256xf32>
    %cst_8 = arith.constant dense<0.000000e+00> : vector<8x256xf32>
    %9 = tpu.matmul %7, %8, %cst_8 {dimension_numbers = #tpu.dot_dimension_numbers<[1], [0], [0], [1], [0, 0, 1, 1], [], []>} : vector<8x512xf32>, vector<512x256xf32>, vector<8x256xf32> -> vector<8x256xf32>
    %c0_9 = arith.constant 0 : index
    %c0_10 = arith.constant 0 : index
    %10 = vector.load %arg5[%c0_9, %c0_10] : memref<1x256xf32, #tpu.memory_space<vmem>>, vector<1x256xf32>
    %11 = vector.broadcast %10 : vector<1x256xf32> to vector<8x256xf32>
    %12 = arith.addf %9, %11 : vector<8x256xf32>
    %cst_11 = arith.constant 0.000000e+00 : f32
    %13 = vector.broadcast %cst_11 : f32 to vector<8x256xf32>
    %14 = arith.maximumf %12, %13 : vector<8x256xf32>
    %c0_12 = arith.constant 0 : index
    %c0_13 = arith.constant 0 : index
    %15 = vector.load %arg6[%c0_12, %c0_13] : memref<256x8xf32, #tpu.memory_space<vmem>>, vector<256x8xf32>
    %cst_14 = arith.constant dense<0.000000e+00> : vector<8x8xf32>
    %16 = tpu.matmul %14, %15, %cst_14 {dimension_numbers = #tpu.dot_dimension_numbers<[1], [0], [0], [1], [0, 0, 1, 1], [], []>} : vector<8x256xf32>, vector<256x8xf32>, vector<8x8xf32> -> vector<8x8xf32>
    %c0_15 = arith.constant 0 : index
    %c0_16 = arith.constant 0 : index
    %17 = vector.load %arg7[%c0_15, %c0_16] : memref<1x8xf32, #tpu.memory_space<vmem>>, vector<1x8xf32>
    %18 = vector.broadcast %17 : vector<1x8xf32> to vector<8x8xf32>
    %19 = arith.addf %16, %18 : vector<8x8xf32>
    %20 = arith.negf %19 : vector<8x8xf32>
    %21 = math.exp %20 : vector<8x8xf32>
    %cst_17 = arith.constant 1.000000e+00 : f32
    %22 = vector.broadcast %cst_17 : f32 to vector<8x8xf32>
    %23 = arith.addf %22, %21 : vector<8x8xf32>
    %24 = arith.divf %22, %23 : vector<8x8xf32>
    %c0_18 = arith.constant 0 : index
    %c0_19 = arith.constant 0 : index
    %25 = vector.load %arg8[%c0_18, %c0_19] : memref<8x8xf32, #tpu.memory_space<vmem>>, vector<8x8xf32>
    tpu.vector_store %arg8[%c0_18, %c0_19], %24 {strides = array<i32>} : memref<8x8xf32, #tpu.memory_space<vmem>>, vector<8x8xf32>,
    return
  }
  func.func @transform_0(%arg0: i32) -> (i32, i32) {
    %c0_i32 = arith.constant 0 : i32
    %c0_i32_0 = arith.constant 0 : i32
    return %arg0, %c0_i32 : i32, i32
  }
  func.func @transform_1(%arg0: i32) -> (i32, i32) {
    %c0_i32 = arith.constant 0 : i32
    %c0_i32_0 = arith.constant 0 : i32
    %c0_i32_1 = arith.constant 0 : i32
    return %c0_i32, %c0_i32_0 : i32, i32
  }
  func.func @transform_2(%arg0: i32) -> (i32, i32) {
    %c0_i32 = arith.constant 0 : i32
    %c0_i32_0 = arith.constant 0 : i32
    %c0_i32_1 = arith.constant 0 : i32
    return %c0_i32, %c0_i32_0 : i32, i32
  }
  func.func @transform_3(%arg0: i32) -> (i32, i32) {
    %c0_i32 = arith.constant 0 : i32
    %c0_i32_0 = arith.constant 0 : i32
    %c0_i32_1 = arith.constant 0 : i32
    return %c0_i32, %c0_i32_0 : i32, i32
  }
  func.func @transform_4(%arg0: i32) -> (i32, i32) {
    %c0_i32 = arith.constant 0 : i32
    %c0_i32_0 = arith.constant 0 : i32
    %c0_i32_1 = arith.constant 0 : i32
    return %c0_i32, %c0_i32_0 : i32, i32
  }
  func.func @transform_5(%arg0: i32) -> (i32, i32) {
    %c0_i32 = arith.constant 0 : i32
    %c0_i32_0 = arith.constant 0 : i32
    %c0_i32_1 = arith.constant 0 : i32
    return %c0_i32, %c0_i32_0 : i32, i32
  }
  func.func @transform_6(%arg0: i32) -> (i32, i32) {
    %c0_i32 = arith.constant 0 : i32
    %c0_i32_0 = arith.constant 0 : i32
    %c0_i32_1 = arith.constant 0 : i32
    return %c0_i32, %c0_i32_0 : i32, i32
  }
  func.func @transform_7(%arg0: i32) -> (i32, i32) {
    %c0_i32 = arith.constant 0 : i32
    %c0_i32_0 = arith.constant 0 : i32
    return %arg0, %c0_i32 : i32, i32
  }
}

</mosaic_0001>

<bundles_post_ra>
// kernel: anomaly_detection_forward.1
= control target key start
LH: loop header
LB: loop body
LE: loop exit
PB: predicated region body
PF: predicated region fallthrough
CT: control target
= control target key end

     0   :  { %vm576_vm3 = vcmask 64512   ;;  %s1315_s1 = inlined_call_operand.vmem [shape: f32[128,512], index: 1, kind: input, shape index: {}]   ;;  %s1316_s0 = inlined_call_operand.vmem [shape: f32[8,128], index: 0, kind: input, shape index: {}]   ;;  %s1317_s3 = inlined_call_operand.vmem [shape: f32[512,256], index: 3, kind: input, shape index: {}]   ;;  %s1318_s2 = inlined_call_operand.vmem [shape: f32[1,512], index: 2, kind: input, shape index: {}]   ;;  %s1319_s5 = inlined_call_operand.vmem [shape: f32[256,8], index: 5, kind: input, shape index: {}]   ;;  %s1320_s6 = inlined_call_operand.vmem [shape: f32[1,8], index: 6, kind: input, shape index: {}]   ;;  %s1321_s4 = inlined_call_operand.vmem [shape: f32[1,256], index: 4, kind: input, shape index: {}]   ;;  %s1322_s7 = inlined_call_operand.vmem [shape: f32[8,8], index: 7, kind: output, shape index: {}]  }
   0x1   :  { %v87_v0 = vld [vmem:[%s1315_s1 + $0x1e0] sm:$0xff]  ;;  %v89_v1 = vld [vmem:[%s1315_s1 + $0x1f0] sm:$0xff]  ;;  %v90_v2 = vld [vmem:[%s1315_s1 + $0x1f8] sm:$0xff] }
   0x2   :  { %101 = vmatpush.msra.mxu0 %v87_v0  ;;  %141 = vmatpush.msra.mxu2 %v89_v1  ;;  %v83_v3 = vld [vmem:[%s1315_s1 + $0x1c0] sm:$0xff]  ;;  %v88_v4 = vld [vmem:[%s1315_s1 + $0x1e8] sm:$0xff]  ;;  %v85_v5 = vld [vmem:[%s1315_s1 + $0x1d0] sm:$0xff] }
   0x3   :  { %161 = vmatpush.msra.mxu3 %v90_v2  ;;  %121 = vmatpush.msra.mxu1 %v88_v4  ;;  %v86_v6 = vld [vmem:[%s1315_s1 + $0x1d8] sm:$0xff]  ;;  %v79_v7 = vld [vmem:[%s1315_s1 + $0x1a0] sm:$0xff]  ;;  %v84_v8 = vld [vmem:[%s1315_s1 + $0x1c8] sm:$0xff] }
   0x4   :  { %102 = vmatpush.msra.mxu0 %v83_v3  ;;  %142 = vmatpush.msra.mxu2 %v85_v5  ;;  %v81_v9 = vld [vmem:[%s1315_s1 + $0x1b0] sm:$0xff]  ;;  %v82_v10 = vld [vmem:[%s1315_s1 + $0x1b8] sm:$0xff]  ;;  %v75_v11 = vld [vmem:[%s1315_s1 + $0x180] sm:$0xff] }
   0x5   :  { %162 = vmatpush.msra.mxu3 %v86_v6  ;;  %122 = vmatpush.msra.mxu1 %v84_v8  ;;  %v80_v12 = vld [vmem:[%s1315_s1 + $0x1a8] sm:$0xff]  ;;  %v77_v13 = vld [vmem:[%s1315_s1 + $0x190] sm:$0xff]  ;;  %v78_v14 = vld [vmem:[%s1315_s1 + $0x198] sm:$0xff] }
   0x6   :  { %103 = vmatpush.msra.mxu0 %v79_v7  ;;  %143 = vmatpush.msra.mxu2 %v81_v9  ;;  %v76_v15 = vld [vmem:[%s1315_s1 + $0x188] sm:$0xff]  ;;  %v71_v16 = vld [vmem:[%s1315_s1 + $0x160] sm:$0xff]  ;;  %v73_v17 = vld [vmem:[%s1315_s1 + $0x170] sm:$0xff] }
   0x7   :  { %163 = vmatpush.msra.mxu3 %v82_v10  ;;  %123 = vmatpush.msra.mxu1 %v80_v12  ;;  %v74_v18 = vld [vmem:[%s1315_s1 + $0x178] sm:$0xff]  ;;  %v72_v19 = vld [vmem:[%s1315_s1 + $0x168] sm:$0xff]  ;;  %v67_v20 = vld [vmem:[%s1315_s1 + $0x140] sm:$0xff] }
   0x8   :  { %104 = vmatpush.msra.mxu0 %v75_v11  ;;  %144 = vmatpush.msra.mxu2 %v77_v13  ;;  %v69_v21 = vld [vmem:[%s1315_s1 + $0x150] sm:$0xff]  ;;  %v70_v22 = vld [vmem:[%s1315_s1 + $0x158] sm:$0xff]  ;;  %v68_v23 = vld [vmem:[%s1315_s1 + $0x148] sm:$0xff] }
   0x9   :  { %164 = vmatpush.msra.mxu3 %v78_v14  ;;  %124 = vmatpush.msra.mxu1 %v76_v15  ;;  %v63_v24 = vld [vmem:[%s1315_s1 + $0x120] sm:$0xff]  ;;  %v65_v25 = vld [vmem:[%s1315_s1 + $0x130] sm:$0xff]  ;;  %v66_v26 = vld [vmem:[%s1315_s1 + $0x138] sm:$0xff] }
   0xa   :  { %105 = vmatpush.msra.mxu0 %v71_v16  ;;  %145 = vmatpush.msra.mxu2 %v73_v17  ;;  %v64_v27 = vld [vmem:[%s1315_s1 + $0x128] sm:$0xff]  ;;  %v59_v28 = vld [vmem:[%s1315_s1 + $0x100] sm:$0xff]  ;;  %v61_v29 = vld [vmem:[%s1315_s1 + $0x110] sm:$0xff] }
   0xb   :  { %165 = vmatpush.msra.mxu3 %v74_v18  ;;  %125 = vmatpush.msra.mxu1 %v72_v19  ;;  %v62_v30 = vld [vmem:[%s1315_s1 + $0x118] sm:$0xff]  ;;  %v60_v31 = vld [vmem:[%s1315_s1 + $0x108] sm:$0xff]  ;;  %v55_v32 = vld [vmem:[%s1315_s1 + $0xe0] sm:$0xff] }
   0xc   :  { %106 = vmatpush.msra.mxu0 %v67_v20  ;;  %146 = vmatpush.msra.mxu2 %v69_v21  ;;  %v57_v33 = vld [vmem:[%s1315_s1 + $0xf0] sm:$0xff]  ;;  %v58_v34 = vld [vmem:[%s1315_s1 + $0xf8] sm:$0xff]  ;;  %v56_v35 = vld [vmem:[%s1315_s1 + $0xe8] sm:$0xff] }
   0xd   :  { %166 = vmatpush.msra.mxu3 %v70_v22  ;;  %126 = vmatpush.msra.mxu1 %v68_v23  ;;  %v51_v36 = vld [vmem:[%s1315_s1 + $0xc0] sm:$0xff]  ;;  %v53_v37 = vld [vmem:[%s1315_s1 + $0xd0] sm:$0xff]  ;;  %v54_v38 = vld [vmem:[%s1315_s1 + $0xd8] sm:$0xff] }
   0xe   :  { %107 = vmatpush.msra.mxu0 %v63_v24  ;;  %147 = vmatpush.msra.mxu2 %v65_v25  ;;  %v52_v39 = vld [vmem:[%s1315_s1 + $0xc8] sm:$0xff]  ;;  %v47_v40 = vld [vmem:[%s1315_s1 + $0xa0] sm:$0xff]  ;;  %v49_v41 = vld [vmem:[%s1315_s1 + $0xb0] sm:$0xff] }
   0xf   :  { %167 = vmatpush.msra.mxu3 %v66_v26  ;;  %127 = vmatpush.msra.mxu1 %v64_v27  ;;  %v50_v42 = vld [vmem:[%s1315_s1 + $0xb8] sm:$0xff]  ;;  %v48_v43 = vld [vmem:[%s1315_s1 + $0xa8] sm:$0xff]  ;;  %v43_v44 = vld [vmem:[%s1315_s1 + $0x80] sm:$0xff] }
  0x10   :  { %108 = vmatpush.msra.mxu0 %v59_v28  ;;  %148 = vmatpush.msra.mxu2 %v61_v29  ;;  %v45_v45 = vld [vmem:[%s1315_s1 + $0x90] sm:$0xff]  ;;  %v46_v46 = vld [vmem:[%s1315_s1 + $0x98] sm:$0xff]  ;;  %v44_v47 = vld [vmem:[%s1315_s1 + $0x88] sm:$0xff] }
  0x11   :  { %168 = vmatpush.msra.mxu3 %v62_v30  ;;  %128 = vmatpush.msra.mxu1 %v60_v31  ;;  %v39_v48 = vld [vmem:[%s1315_s1 + $0x60] sm:$0xff]  ;;  %v41_v49 = vld [vmem:[%s1315_s1 + $0x70] sm:$0xff]  ;;  %v42_v50 = vld [vmem:[%s1315_s1 + $0x78] sm:$0xff] }
  0x12   :  { %109 = vmatpush.msra.mxu0 %v55_v32  ;;  %149 = vmatpush.msra.mxu2 %v57_v33  ;;  %v40_v51 = vld [vmem:[%s1315_s1 + $0x68] sm:$0xff]  ;;  %v35_v52 = vld [vmem:[%s1315_s1 + $0x40] sm:$0xff]  ;;  %v37_v53 = vld [vmem:[%s1315_s1 + $0x50] sm:$0xff] }
  0x13   :  { %169 = vmatpush.msra.mxu3 %v58_v34  ;;  %129 = vmatpush.msra.mxu1 %v56_v35  ;;  %v38_v54 = vld [vmem:[%s1315_s1 + $0x58] sm:$0xff]  ;;  %v36_v55 = vld [vmem:[%s1315_s1 + $0x48] sm:$0xff]  ;;  %v31_v56 = vld [vmem:[%s1315_s1 + $0x20] sm:$0xff] }
  0x14   :  { %110 = vmatpush.msra.mxu0 %v51_v36  ;;  %150 = vmatpush.msra.mxu2 %v53_v37  ;;  %v33_v57 = vld [vmem:[%s1315_s1 + $0x30] sm:$0xff]  ;;  %v34_v58 = vld [vmem:[%s1315_s1 + $0x38] sm:$0xff]  ;;  %v32_v59 = vld [vmem:[%s1315_s1 + $0x28] sm:$0xff] }
  0x15   :  { %170 = vmatpush.msra.mxu3 %v54_v38  ;;  %130 = vmatpush.msra.mxu1 %v52_v39  ;;  %v27_v60 = vld [vmem:[%s1315_s1] sm:$0xff]  ;;  %v29_v61 = vld [vmem:[%s1315_s1 + $0x10] sm:$0xff]  ;;  %v30_v62 = vld [vmem:[%s1315_s1 + $0x18] sm:$0xff] }
  0x16   :  { %111 = vmatpush.msra.mxu0 %v47_v40  ;;  %151 = vmatpush.msra.mxu2 %v49_v41  ;;  %v26_v63 = vld [vmem:[%s1316_s0] sm:$0xff]  ;;  %v28_v0 = vld [vmem:[%s1315_s1 + $0x8] sm:$0xff]  ;;  %v215_v1 = vld [vmem:[%s1317_s3 + $0xf0] sm:$0xff] }
  0x17   :  { %171 = vmatpush.msra.mxu3 %v50_v42  ;;  %131 = vmatpush.msra.mxu1 %v48_v43  ;;  %v279_v2 = vld [vmem:[%s1317_s3 + $0x2f0] sm:$0xff]  ;;  %v213_v3 = vld [vmem:[%s1317_s3 + $0xe0] sm:$0xff] }
  0x18   :  { %112 = vmatpush.msra.mxu0 %v43_v44  ;;  %152 = vmatpush.msra.mxu2 %v45_v45  ;;  %v247_v4 = vld [vmem:[%s1317_s3 + $0x1f0] sm:$0xff]  ;;  %v277_v6 = vld [vmem:[%s1317_s3 + $0x2e0] sm:$0xff] }
  0x19   :  { %172 = vmatpush.msra.mxu3 %v46_v46  ;;  %132 = vmatpush.msra.mxu1 %v44_v47  ;;  %v311_v5 = vld [vmem:[%s1317_s3 + $0x3f0] sm:$0xff]  ;;  %v245_v8 = vld [vmem:[%s1317_s3 + $0x1e0] sm:$0xff] }
  0x1a   :  { %113 = vmatpush.msra.mxu0 %v39_v48  ;;  %153 = vmatpush.msra.mxu2 %v41_v49  ;;  %v211_v7 = vld [vmem:[%s1317_s3 + $0xd0] sm:$0xff]  ;;  %v309_v9 = vld [vmem:[%s1317_s3 + $0x3e0] sm:$0xff] }
  0x1b   :  { %173 = vmatpush.msra.mxu3 %v42_v50  ;;  %133 = vmatpush.msra.mxu1 %v40_v51  ;;  %v275_v10 = vld [vmem:[%s1317_s3 + $0x2d0] sm:$0xff]  ;;  %v209_v11 = vld [vmem:[%s1317_s3 + $0xc0] sm:$0xff] }
  0x1c   :  { %114 = vmatpush.msra.mxu0 %v35_v52  ;;  %154 = vmatpush.msra.mxu2 %v37_v53  ;;  %v243_v12 = vld [vmem:[%s1317_s3 + $0x1d0] sm:$0xff]  ;;  %v273_v14 = vld [vmem:[%s1317_s3 + $0x2c0] sm:$0xff] }
  0x1d   :  { %174 = vmatpush.msra.mxu3 %v38_v54  ;;  %134 = vmatpush.msra.mxu1 %v36_v55  ;;  %v307_v13 = vld [vmem:[%s1317_s3 + $0x3d0] sm:$0xff]  ;;  %v241_v16 = vld [vmem:[%s1317_s3 + $0x1c0] sm:$0xff] }
  0x1e   :  { %115 = vmatpush.msra.mxu0 %v31_v56  ;;  %155 = vmatpush.msra.mxu2 %v33_v57  ;;  %v207_v15 = vld [vmem:[%s1317_s3 + $0xb0] sm:$0xff]  ;;  %v305_v17 = vld [vmem:[%s1317_s3 + $0x3c0] sm:$0xff] }
  0x1f   :  { %175 = vmatpush.msra.mxu3 %v34_v58  ;;  %135 = vmatpush.msra.mxu1 %v32_v59  ;;  %v271_v18 = vld [vmem:[%s1317_s3 + $0x2b0] sm:$0xff]  ;;  %v205_v19 = vld [vmem:[%s1317_s3 + $0xa0] sm:$0xff] }
  0x20   :  { %116 = vmatpush.msra.mxu0 %v27_v60  ;;  %156 = vmatpush.msra.mxu2 %v29_v61  ;;  %v239_v20 = vld [vmem:[%s1317_s3 + $0x1b0] sm:$0xff]  ;;  %v269_v22 = vld [vmem:[%s1317_s3 + $0x2a0] sm:$0xff]  ;;  %v216_v61 = vld [vmem:[%s1317_s3 + $0xf8] sm:$0xff] }
  0x21   :  { %176 = vmatpush.msra.mxu3 %v30_v62  ;;  %117 = vmatmul.f32.vlgmr.msra.gmra.mxu0 %v26_v63  ;;  %v303_v21 = vld [vmem:[%s1317_s3 + $0x3b0] sm:$0xff]  ;;  %v237_v24 = vld [vmem:[%s1317_s3 + $0x1a0] sm:$0xff] }
  0x22   :  { %157 = vmatmul.f32.vlgmr.msra.gmra.mxu2 %v26_v63  ;;  %177 = vmatmul.f32.vlgmr.msra.gmra.mxu3 %v26_v63  ;;  %v203_v23 = vld [vmem:[%s1317_s3 + $0x90] sm:$0xff]  ;;  %v301_v25 = vld [vmem:[%s1317_s3 + $0x3a0] sm:$0xff] }
  0x23   :  { %136 = vmatpush.msra.mxu1 %v28_v0  ;;  %319 = vmatpush.msrb.mxu0 %v215_v1  ;;  %v267_v26 = vld [vmem:[%s1317_s3 + $0x290] sm:$0xff]  ;;  %v201_v27 = vld [vmem:[%s1317_s3 + $0x80] sm:$0xff]  ;;  %v214_v1 = vld [vmem:[%s1317_s3 + $0xe8] sm:$0xff] }
  0x24   :  { %137 = vmatmul.f32.vlgmr.msra.gmra.mxu1 %v26_v63  ;;  %359 = vmatpush.msrb.mxu2 %v279_v2  ;;  %v235_v28 = vld [vmem:[%s1317_s3 + $0x190] sm:$0xff]  ;;  %v265_v30 = vld [vmem:[%s1317_s3 + $0x280] sm:$0xff]  ;;  %v248_v2 = vld [vmem:[%s1317_s3 + $0x1f8] sm:$0xff] }
  0x25   :  { %320 = vmatpush.msrb.mxu0 %v213_v3  ;;  %339 = vmatpush.msrb.mxu1 %v247_v4  ;;  %v299_v29 = vld [vmem:[%s1317_s3 + $0x390] sm:$0xff]  ;;  %v233_v32 = vld [vmem:[%s1317_s3 + $0x180] sm:$0xff]  ;;  %v280_v4 = vld [vmem:[%s1317_s3 + $0x2f8] sm:$0xff] }
  0x26   :  { %379 = vmatpush.msrb.mxu3 %v311_v5  ;;  %360 = vmatpush.msrb.mxu2 %v277_v6  ;;  %v199_v31 = vld [vmem:[%s1317_s3 + $0x70] sm:$0xff]  ;;  %v297_v33 = vld [vmem:[%s1317_s3 + $0x380] sm:$0xff]  ;;  %v212_v5 = vld [vmem:[%s1317_s3 + $0xd8] sm:$0xff] }
  0x27   :  { %321 = vmatpush.msrb.mxu0 %v211_v7  ;;  %340 = vmatpush.msrb.mxu1 %v245_v8  ;;  %v263_v34 = vld [vmem:[%s1317_s3 + $0x270] sm:$0xff]  ;;  %v197_v35 = vld [vmem:[%s1317_s3 + $0x60] sm:$0xff]  ;;  %v246_v6 = vld [vmem:[%s1317_s3 + $0x1e8] sm:$0xff] }
  0x28   :  { %380 = vmatpush.msrb.mxu3 %v309_v9  ;;  %361 = vmatpush.msrb.mxu2 %v275_v10  ;;  %v231_v36 = vld [vmem:[%s1317_s3 + $0x170] sm:$0xff]  ;;  %v261_v38 = vld [vmem:[%s1317_s3 + $0x260] sm:$0xff]  ;;  %v312_v7 = vld [vmem:[%s1317_s3 + $0x3f8] sm:$0xff] }
  0x29   :  { %322 = vmatpush.msrb.mxu0 %v209_v11  ;;  %341 = vmatpush.msrb.mxu1 %v243_v12  ;;  %v295_v37 = vld [vmem:[%s1317_s3 + $0x370] sm:$0xff]  ;;  %v229_v40 = vld [vmem:[%s1317_s3 + $0x160] sm:$0xff]  ;;  %v278_v8 = vld [vmem:[%s1317_s3 + $0x2e8] sm:$0xff] }
  0x2a   :  { %381 = vmatpush.msrb.mxu3 %v307_v13  ;;  %362 = vmatpush.msrb.mxu2 %v273_v14  ;;  %v195_v39 = vld [vmem:[%s1317_s3 + $0x50] sm:$0xff]  ;;  %v293_v41 = vld [vmem:[%s1317_s3 + $0x360] sm:$0xff]  ;;  %v210_v9 = vld [vmem:[%s1317_s3 + $0xc8] sm:$0xff] }
  0x2b   :  { %323 = vmatpush.msrb.mxu0 %v207_v15  ;;  %342 = vmatpush.msrb.mxu1 %v241_v16  ;;  %v259_v42 = vld [vmem:[%s1317_s3 + $0x250] sm:$0xff]  ;;  %v193_v43 = vld [vmem:[%s1317_s3 + $0x40] sm:$0xff]  ;;  %v244_v10 = vld [vmem:[%s1317_s3 + $0x1d8] sm:$0xff] }
  0x2c   :  { %382 = vmatpush.msrb.mxu3 %v305_v17  ;;  %363 = vmatpush.msrb.mxu2 %v271_v18  ;;  %v227_v44 = vld [vmem:[%s1317_s3 + $0x150] sm:$0xff]  ;;  %v257_v46 = vld [vmem:[%s1317_s3 + $0x240] sm:$0xff]  ;;  %v310_v11 = vld [vmem:[%s1317_s3 + $0x3e8] sm:$0xff] }
  0x2d   :  { %324 = vmatpush.msrb.mxu0 %v205_v19  ;;  %343 = vmatpush.msrb.mxu1 %v239_v20  ;;  %v291_v45 = vld [vmem:[%s1317_s3 + $0x350] sm:$0xff]  ;;  %v225_v48 = vld [vmem:[%s1317_s3 + $0x140] sm:$0xff]  ;;  %v276_v12 = vld [vmem:[%s1317_s3 + $0x2d8] sm:$0xff] }
  0x2e   :  { %383 = vmatpush.msrb.mxu3 %v303_v21  ;;  %364 = vmatpush.msrb.mxu2 %v269_v22  ;;  %v191_v47 = vld [vmem:[%s1317_s3 + $0x30] sm:$0xff]  ;;  %v289_v49 = vld [vmem:[%s1317_s3 + $0x340] sm:$0xff]  ;;  %v208_v13 = vld [vmem:[%s1317_s3 + $0xb8] sm:$0xff] }
  0x2f   :  { %325 = vmatpush.msrb.mxu0 %v203_v23  ;;  %344 = vmatpush.msrb.mxu1 %v237_v24  ;;  %v255_v50 = vld [vmem:[%s1317_s3 + $0x230] sm:$0xff]  ;;  %v189_v51 = vld [vmem:[%s1317_s3 + $0x20] sm:$0xff]  ;;  %v242_v14 = vld [vmem:[%s1317_s3 + $0x1c8] sm:$0xff] }
  0x30   :  { %384 = vmatpush.msrb.mxu3 %v301_v25  ;;  %365 = vmatpush.msrb.mxu2 %v267_v26  ;;  %v223_v52 = vld [vmem:[%s1317_s3 + $0x130] sm:$0xff]  ;;  %v253_v54 = vld [vmem:[%s1317_s3 + $0x220] sm:$0xff]  ;;  %v308_v15 = vld [vmem:[%s1317_s3 + $0x3d8] sm:$0xff] }
  0x31   :  { %326 = vmatpush.msrb.mxu0 %v201_v27  ;;  %345 = vmatpush.msrb.mxu1 %v235_v28  ;;  %v287_v53 = vld [vmem:[%s1317_s3 + $0x330] sm:$0xff]  ;;  %v221_v56 = vld [vmem:[%s1317_s3 + $0x120] sm:$0xff]  ;;  %v274_v16 = vld [vmem:[%s1317_s3 + $0x2c8] sm:$0xff] }
  0x32   :  { %385 = vmatpush.msrb.mxu3 %v299_v29  ;;  %366 = vmatpush.msrb.mxu2 %v265_v30  ;;  %v187_v55 = vld [vmem:[%s1317_s3 + $0x10] sm:$0xff]  ;;  %v285_v57 = vld [vmem:[%s1317_s3 + $0x320] sm:$0xff]  ;;  %v206_v17 = vld [vmem:[%s1317_s3 + $0xa8] sm:$0xff] }
  0x33   :  { %327 = vmatpush.msrb.mxu0 %v199_v31  ;;  %346 = vmatpush.msrb.mxu1 %v233_v32  ;;  %v251_v58 = vld [vmem:[%s1317_s3 + $0x210] sm:$0xff]  ;;  %v185_v59 = vld [vmem:[%s1317_s3] sm:$0xff]  ;;  %v240_v18 = vld [vmem:[%s1317_s3 + $0x1b8] sm:$0xff] }
  0x34   :  { %386 = vmatpush.msrb.mxu3 %v297_v33  ;;  %367 = vmatpush.msrb.mxu2 %v263_v34  ;;  %v219_v60 = vld [vmem:[%s1317_s3 + $0x110] sm:$0xff]  ;;  %v217_v63 = vld [vmem:[%s1317_s3 + $0x100] sm:$0xff]  ;;  %v306_v19 = vld [vmem:[%s1317_s3 + $0x3c8] sm:$0xff] }
  0x35   :  { %328 = vmatpush.msrb.mxu0 %v197_v35  ;;  %347 = vmatpush.msrb.mxu1 %v231_v36  ;;  %v283_v62 = vld [vmem:[%s1317_s3 + $0x310] sm:$0xff]  ;;  %v249_v0 = vld [vmem:[%s1317_s3 + $0x200] sm:$0xff]  ;;  %v272_v20 = vld [vmem:[%s1317_s3 + $0x2b8] sm:$0xff] }
  0x36   :  { %387 = vmatpush.msrb.mxu3 %v295_v37  ;;  %368 = vmatpush.msrb.mxu2 %v261_v38  ;;  %v281_v3 = vld [vmem:[%s1317_s3 + $0x300] sm:$0xff]  ;;  %v204_v21 = vld [vmem:[%s1317_s3 + $0x98] sm:$0xff]  ;;  %v238_v22 = vld [vmem:[%s1317_s3 + $0x1a8] sm:$0xff] }
  0x37   :  { %329 = vmatpush.msrb.mxu0 %v195_v39  ;;  %348 = vmatpush.msrb.mxu1 %v229_v40  ;;  %v304_v23 = vld [vmem:[%s1317_s3 + $0x3b8] sm:$0xff]  ;;  %v270_v24 = vld [vmem:[%s1317_s3 + $0x2a8] sm:$0xff] }
  0x38   :  { %388 = vmatpush.msrb.mxu3 %v293_v41  ;;  %369 = vmatpush.msrb.mxu2 %v259_v42  ;;  %v202_v25 = vld [vmem:[%s1317_s3 + $0x88] sm:$0xff]  ;;  %v236_v26 = vld [vmem:[%s1317_s3 + $0x198] sm:$0xff] }
  0x39   :  { %330 = vmatpush.msrb.mxu0 %v193_v43  ;;  %349 = vmatpush.msrb.mxu1 %v227_v44  ;;  %v302_v27 = vld [vmem:[%s1317_s3 + $0x3a8] sm:$0xff]  ;;  %v200_v28 = vld [vmem:[%s1317_s3 + $0x78] sm:$0xff] }
  0x3a   :  { %389 = vmatpush.msrb.mxu3 %v291_v45  ;;  %370 = vmatpush.msrb.mxu2 %v257_v46  ;;  %v234_v29 = vld [vmem:[%s1317_s3 + $0x188] sm:$0xff]  ;;  %v232_v31 = vld [vmem:[%s1317_s3 + $0x178] sm:$0xff] }
  0x3b   :  { %331 = vmatpush.msrb.mxu0 %v191_v47  ;;  %350 = vmatpush.msrb.mxu1 %v225_v48  ;;  %v198_v30 = vld [vmem:[%s1317_s3 + $0x68] sm:$0xff]  ;;  %v268_v32 = vld [vmem:[%s1317_s3 + $0x298] sm:$0xff] }
  0x3c   :  { %390 = vmatpush.msrb.mxu3 %v289_v49  ;;  %371 = vmatpush.msrb.mxu2 %v255_v50  ;;  %v300_v33 = vld [vmem:[%s1317_s3 + $0x398] sm:$0xff]  ;;  %v230_v35 = vld [vmem:[%s1317_s3 + $0x168] sm:$0xff] }
  0x3d   :  { %332 = vmatpush.msrb.mxu0 %v189_v51  ;;  %351 = vmatpush.msrb.mxu1 %v223_v52  ;;  %v196_v34 = vld [vmem:[%s1317_s3 + $0x58] sm:$0xff]  ;;  %v266_v36 = vld [vmem:[%s1317_s3 + $0x288] sm:$0xff] }
  0x3e   :  { %391 = vmatpush.msrb.mxu3 %v287_v53  ;;  %372 = vmatpush.msrb.mxu2 %v253_v54  ;;  %v298_v37 = vld [vmem:[%s1317_s3 + $0x388] sm:$0xff]  ;;  %v228_v39 = vld [vmem:[%s1317_s3 + $0x158] sm:$0xff] }
  0x3f   :  { %333 = vmatpush.msrb.mxu0 %v187_v55  ;;  %352 = vmatpush.msrb.mxu1 %v221_v56  ;;  %v194_v38 = vld [vmem:[%s1317_s3 + $0x48] sm:$0xff]  ;;  %v264_v40 = vld [vmem:[%s1317_s3 + $0x278] sm:$0xff] }
  0x40   :  { %392 = vmatpush.msrb.mxu3 %v285_v57  ;;  %373 = vmatpush.msrb.mxu2 %v251_v58  ;;  %v296_v41 = vld [vmem:[%s1317_s3 + $0x378] sm:$0xff]  ;;  %v226_v43 = vld [vmem:[%s1317_s3 + $0x148] sm:$0xff] }
  0x41   :  { %334 = vmatpush.msrb.mxu0 %v185_v59  ;;  %353 = vmatpush.msrb.mxu1 %v219_v60  ;;  %v192_v42 = vld [vmem:[%s1317_s3 + $0x38] sm:$0xff]  ;;  %v262_v44 = vld [vmem:[%s1317_s3 + $0x268] sm:$0xff] }
  0x42   :  { %393 = vmatpush.msrb.mxu3 %v283_v62  ;;  %374 = vmatpush.msrb.mxu2 %v249_v0  ;;  %v294_v45 = vld [vmem:[%s1317_s3 + $0x368] sm:$0xff]  ;;  %v224_v47 = vld [vmem:[%s1317_s3 + $0x138] sm:$0xff] }
  0x43   :  { %399 = vmatpush.msra.mxu0 %v216_v61  ;;  %354 = vmatpush.msrb.mxu1 %v217_v63  ;;  %v190_v46 = vld [vmem:[%s1317_s3 + $0x28] sm:$0xff]  ;;  %v260_v48 = vld [vmem:[%s1317_s3 + $0x258] sm:$0xff] }
  0x44   :  { %394 = vmatpush.msrb.mxu3 %v281_v3  ;;  %439 = vmatpush.msra.mxu2 %v280_v4  ;;  %v292_v49 = vld [vmem:[%s1317_s3 + $0x358] sm:$0xff]  ;;  %v222_v51 = vld [vmem:[%s1317_s3 + $0x128] sm:$0xff] }
  0x45   :  { %400 = vmatpush.msra.mxu0 %v214_v1  ;;  %419 = vmatpush.msra.mxu1 %v248_v2  ;;  %v188_v50 = vld [vmem:[%s1317_s3 + $0x18] sm:$0xff]  ;;  %v258_v52 = vld [vmem:[%s1317_s3 + $0x248] sm:$0xff]  ;;  %v91_v1 = vld [vmem:[%s1318_s2] sm:$0xf] }
  0x46   :  { %459 = vmatpush.msra.mxu3 %v312_v7  ;;  %440 = vmatpush.msra.mxu2 %v278_v8  ;;  %v290_v53 = vld [vmem:[%s1317_s3 + $0x348] sm:$0xff]  ;;  %v220_v55 = vld [vmem:[%s1317_s3 + $0x118] sm:$0xff]  ;;  %v93_v2 = vperm.slane %v91_v1, 0  ;;  %v94_v4 = vperm.slane %v91_v1, 1 }
  0x47   :  { %401 = vmatpush.msra.mxu0 %v212_v5  ;;  %420 = vmatpush.msra.mxu1 %v246_v6  ;;  %v186_v54 = vld [vmem:[%s1317_s3 + $0x8] sm:$0xff]  ;;  %v256_v56 = vld [vmem:[%s1317_s3 + $0x238] sm:$0xff] }
  0x48   :  { %460 = vmatpush.msra.mxu3 %v310_v11  ;;  %441 = vmatpush.msra.mxu2 %v276_v12  ;;  %v288_v57 = vld [vmem:[%s1317_s3 + $0x338] sm:$0xff]  ;;  %v218_v58 = vld [vmem:[%s1317_s3 + $0x108] sm:$0xff]  ;;  %v96_v11 = vperm.slane %v91_v1, 3  ;;  %v495_v12 = vld [vmem:[%s1319_s5 + $0x70] sm:$0xff] }
  0x49   :  { %402 = vmatpush.msra.mxu0 %v210_v9  ;;  %421 = vmatpush.msra.mxu1 %v244_v10  ;;  %v254_v59 = vld [vmem:[%s1317_s3 + $0x228] sm:$0xff]  ;;  %v252_v61 = vld [vmem:[%s1317_s3 + $0x218] sm:$0xff]  ;;  %v95_v10 = vperm.slane %v91_v1, 2 }
  0x4a   :  { %461 = vmatpush.msra.mxu3 %v308_v15  ;;  %442 = vmatpush.msra.mxu2 %v274_v16  ;;  %v286_v60 = vld [vmem:[%s1317_s3 + $0x328] sm:$0xff]  ;;  %v284_v62 = vld [vmem:[%s1317_s3 + $0x318] sm:$0xff] }
  0x4b   :  { %403 = vmatpush.msra.mxu0 %v208_v13  ;;  %422 = vmatpush.msra.mxu1 %v242_v14  ;;  %v250_v63 = vld [vmem:[%s1317_s3 + $0x208] sm:$0xff]  ;;  %v496_v8 = vld [vmem:[%s1319_s5 + $0x78] sm:$0xff] }
  0x4c   :  { %462 = vmatpush.msra.mxu3 %v306_v19  ;;  %443 = vmatpush.msra.mxu2 %v272_v20  ;;  %v282_v0 = vld [vmem:[%s1317_s3 + $0x308] sm:$0xff]  ;;  %v512_v14 = vld [vmem:[%s1319_s5 + $0xf8] sm:$0xff]  ;;  %v511_v20 = vld [vmem:[%s1319_s5 + $0xf0] sm:$0xff] }
  0x4d   :  { %404 = vmatpush.msra.mxu0 %v206_v17  ;;  %423 = vmatpush.msra.mxu1 %v240_v18  ;;  %v494_v17 = vld [vmem:[%s1319_s5 + $0x68] sm:$0xff] }
  0x4e   :  { %463 = vmatpush.msra.mxu3 %v304_v23  ;;  %444 = vmatpush.msra.mxu2 %v270_v24  ;;  %v493_v23 = vld [vmem:[%s1319_s5 + $0x60] sm:$0xff]  ;;  %v492_v24 = vld [vmem:[%s1319_s5 + $0x58] sm:$0xff] }
  0x4f   :  { %405 = vmatpush.msra.mxu0 %v204_v21  ;;  %424 = vmatpush.msra.mxu1 %v238_v22 }
  0x50   :  { %464 = vmatpush.msra.mxu3 %v302_v27  ;;  %445 = vmatpush.msra.mxu2 %v268_v32  ;;  %v510_v27 = vld [vmem:[%s1319_s5 + $0xe8] sm:$0xff]  ;;  %v487_v32 = vld [vmem:[%s1319_s5 + $0x30] sm:$0xff] }
  0x51   :  { %406 = vmatpush.msra.mxu0 %v202_v25  ;;  %425 = vmatpush.msra.mxu1 %v236_v26  ;;  %v491_v25 = vld [vmem:[%s1319_s5 + $0x50] sm:$0xff]  ;;  %v490_v26 = vld [vmem:[%s1319_s5 + $0x48] sm:$0xff] }
  0x52   :  { %465 = vmatpush.msra.mxu3 %v300_v33  ;;  %446 = vmatpush.msra.mxu2 %v266_v36  ;;  %v507_v33 = vld [vmem:[%s1319_s5 + $0xd0] sm:$0xff]  ;;  %v485_v36 = vld [vmem:[%s1319_s5 + $0x20] sm:$0xff] }
  0x53   :  { %407 = vmatpush.msra.mxu0 %v200_v28  ;;  %426 = vmatpush.msra.mxu1 %v234_v29  ;;  %v489_v28 = vld [vmem:[%s1319_s5 + $0x40] sm:$0xff] }
  0x54   :  { %466 = vmatpush.msra.mxu3 %v298_v37  ;;  %447 = vmatpush.msra.mxu2 %v264_v40  ;;  %v509_v29 = vld [vmem:[%s1319_s5 + $0xe0] sm:$0xff]  ;;  %v483_v40 = vld [vmem:[%s1319_s5 + $0x10] sm:$0xff] }
  0x55   :  { %408 = vmatpush.msra.mxu0 %v198_v30  ;;  %427 = vmatpush.msra.mxu1 %v232_v31  ;;  %v488_v30 = vld [vmem:[%s1319_s5 + $0x38] sm:$0xff]  ;;  %v505_v37 = vld [vmem:[%s1319_s5 + $0xc0] sm:$0xff] }
  0x56   :  { %467 = vmatpush.msra.mxu3 %v296_v41  ;;  %448 = vmatpush.msra.mxu2 %v262_v44  ;;  %v508_v31 = vld [vmem:[%s1319_s5 + $0xd8] sm:$0xff]  ;;  %v503_v41 = vld [vmem:[%s1319_s5 + $0xb0] sm:$0xff]  ;;  %v481_v44 = vld [vmem:[%s1319_s5] sm:$0xff] }
  0x57   :  { %409 = vmatpush.msra.mxu0 %v196_v34  ;;  %428 = vmatpush.msra.mxu1 %v230_v35  ;;  %v486_v34 = vld [vmem:[%s1319_s5 + $0x28] sm:$0xff] }
  0x58   :  { %468 = vmatpush.msra.mxu3 %v294_v45  ;;  %449 = vmatpush.msra.mxu2 %v260_v48  ;;  %v506_v35 = vld [vmem:[%s1319_s5 + $0xc8] sm:$0xff]  ;;  %v501_v45 = vld [vmem:[%s1319_s5 + $0xa0] sm:$0xff] }
  0x59   :  { %410 = vmatpush.msra.mxu0 %v194_v38  ;;  %429 = vmatpush.msra.mxu1 %v228_v39  ;;  %v484_v38 = vld [vmem:[%s1319_s5 + $0x18] sm:$0xff]  ;;  %v498_v48 = vld [vmem:[%s1319_s5 + $0x88] sm:$0xff] }
  0x5a   :  { %469 = vmatpush.msra.mxu3 %v292_v49  ;;  %450 = vmatpush.msra.mxu2 %v258_v52  ;;  %v504_v39 = vld [vmem:[%s1319_s5 + $0xb8] sm:$0xff]  ;;  %v497_v49 = vld [vmem:[%s1319_s5 + $0x80] sm:$0xff] }
  0x5b   :  { %411 = vmatpush.msra.mxu0 %v192_v42  ;;  %430 = vmatpush.msra.mxu1 %v226_v43  ;;  %v482_v42 = vld [vmem:[%s1319_s5 + $0x8] sm:$0xff] }
  0x5c   :  { %470 = vmatpush.msra.mxu3 %v290_v53  ;;  %451 = vmatpush.msra.mxu2 %v256_v56  ;;  %v502_v43 = vld [vmem:[%s1319_s5 + $0xa8] sm:$0xff] }
  0x5d   :  { %412 = vmatpush.msra.mxu0 %v190_v46  ;;  %431 = vmatpush.msra.mxu1 %v224_v47  ;;  %v500_v46 = vld [vmem:[%s1319_s5 + $0x98] sm:$0xff]  ;;  %v499_v47 = vld [vmem:[%s1319_s5 + $0x90] sm:$0xff] }
  0x5e   :  { %471 = vmatpush.msra.mxu3 %v288_v57  ;;  %452 = vmatpush.msra.mxu2 %v254_v59 }
  0x5f   :  { %413 = vmatpush.msra.mxu0 %v188_v50  ;;  %432 = vmatpush.msra.mxu1 %v222_v51  ;;  %v313_v50 = vld [vmem:[%s1321_s4] sm:$0x3] }
  0x60   :  { %472 = vmatpush.msra.mxu3 %v286_v60  ;;  %453 = vmatpush.msra.mxu2 %v252_v61  ;;  %v315_v51 = vperm.slane %v313_v50, 0  ;;  %v316_v56 = vperm.slane %v313_v50, 1 }
  0x61   :  { %414 = vmatpush.msra.mxu0 %v186_v54  ;;  %433 = vmatpush.msra.mxu1 %v220_v55 }
  0x62   :  { %473 = vmatpush.msra.mxu3 %v284_v62  ;;  %454 = vmatpush.msra.mxu2 %v250_v63 }
  0x63   :  { %434 = vmatpush.msra.mxu1 %v218_v58 }
  0x64   :  { %474 = vmatpush.msra.mxu3 %v282_v0 }
  0x9e   :  { %v118_v3 = vpop.f32.mrf.mxu0 }
  0x9f   :  { %v119_v5 = vadd.f32 %v118_v3, %v93_v2 }
  0xa1   :  { %v181_v6 = vmax.f32 %v119_v5, 0.0  ;;  %v138_v7 = vpop.f32.mrf.mxu1 }
  0xa2   :  { %v139_v9 = vadd.f32 %v138_v7, %v94_v4  ;;  %v583_v7 = vld [vmem:[%s1320_s6] ss:$0 sm:$0xff] }
  0xa3   :  { %335 = vmatmul.f32.vlgmr.msrb.gmra.mxu0 %v181_v6 }
  0xa4   :  { %v182_v13 = vmax.f32 %v139_v9, 0.0  ;;  %517 = vmatpush.msrb.mxu0 %v496_v8 }
  0xa5   :  { %v158_v15 = vpop.f32.mrf.mxu2  ;;  %v178_v16 = vpop.f32.mrf.mxu3 }
  0xa6   :  { %v159_v18 = vadd.f32 %v158_v15, %v95_v10  ;;  %v179_v19 = vadd.f32 %v178_v16, %v96_v11  ;;  %355 = vmatmul.f32.vlgmr.msrb.gmra.mxu1 %v182_v13  ;;  %518 = vmatpush.msrb.mxu0 %v495_v12 }
  0xa7   :  { %537 = vmatpush.msrb.mxu1 %v512_v14 }
  0xa8   :  { %v183_v21 = vmax.f32 %v159_v18, 0.0  ;;  %v184_v22 = vmax.f32 %v179_v19, 0.0  ;;  %519 = vmatpush.msrb.mxu0 %v494_v17 }
  0xa9   :  { %538 = vmatpush.msrb.mxu1 %v511_v20 }
  0xaa   :  { %375 = vmatmul.f32.vlgmr.msrb.gmra.mxu2 %v183_v21  ;;  %395 = vmatmul.f32.vlgmr.msrb.gmra.mxu3 %v184_v22 }
  0xab   :  { %415 = vmatmul.f32.vlgmr.msra.gmra.mxu0 %v181_v6  ;;  %539 = vmatpush.msrb.mxu1 %v510_v27 }
  0xac   :  { %520 = vmatpush.msrb.mxu0 %v493_v23 }
  0xad   :  { %540 = vmatpush.msrb.mxu1 %v509_v29 }
  0xae   :  { %435 = vmatmul.f32.vlgmr.msra.gmra.mxu1 %v182_v13  ;;  %521 = vmatpush.msrb.mxu0 %v492_v24 }
  0xaf   :  { %541 = vmatpush.msrb.mxu1 %v508_v31 }
  0xb0   :  { %522 = vmatpush.msrb.mxu0 %v491_v25 }
  0xb1   :  { %542 = vmatpush.msrb.mxu1 %v507_v33 }
  0xb2   :  { %455 = vmatmul.f32.vlgmr.msra.gmra.mxu2 %v183_v21  ;;  %475 = vmatmul.f32.vlgmr.msra.gmra.mxu3 %v184_v22 }
  0xb3   :  { %523 = vmatpush.msrb.mxu0 %v490_v26  ;;  %543 = vmatpush.msrb.mxu1 %v506_v35 }
  0xb5   :  { %524 = vmatpush.msrb.mxu0 %v489_v28  ;;  %544 = vmatpush.msrb.mxu1 %v505_v37 }
  0xb7   :  { %525 = vmatpush.msrb.mxu0 %v488_v30  ;;  %545 = vmatpush.msrb.mxu1 %v504_v39 }
  0xb9   :  { %526 = vmatpush.msrb.mxu0 %v487_v32  ;;  %546 = vmatpush.msrb.mxu1 %v503_v41 }
  0xbb   :  { %527 = vmatpush.msrb.mxu0 %v486_v34  ;;  %547 = vmatpush.msrb.mxu1 %v502_v43 }
  0xbd   :  { %528 = vmatpush.msrb.mxu0 %v485_v36  ;;  %548 = vmatpush.msrb.mxu1 %v501_v45 }
  0xbf   :  { %529 = vmatpush.msrb.mxu0 %v484_v38  ;;  %549 = vmatpush.msrb.mxu1 %v500_v46 }
  0xc1   :  { %530 = vmatpush.msrb.mxu0 %v483_v40  ;;  %550 = vmatpush.msrb.mxu1 %v499_v47 }
  0xc3   :  { %531 = vmatpush.msrb.mxu0 %v482_v42  ;;  %551 = vmatpush.msrb.mxu1 %v498_v48 }
  0xc5   :  { %532 = vmatpush.msrb.mxu0 %v481_v44  ;;  %552 = vmatpush.msrb.mxu1 %v497_v49 }
 0x120   :  { %v336_v52 = vpop.f32.mrf.mxu0 }
 0x121   :  { %v337_v53 = vadd.f32 %v336_v52, %v315_v51 }
 0x123   :  { %v356_v54 = vpop.f32.mrf.mxu1 }
 0x124   :  { %v357_v55 = vadd.f32 %v356_v54, %v337_v53 }
 0x128   :  { %v416_v57 = vpop.f32.mrf.mxu0 }
 0x129   :  { %v417_v61 = vadd.f32 %v416_v57, %v316_v56 }
 0x12b   :  { %v436_v63 = vpop.f32.mrf.mxu1 }
 0x12c   :  { %v437_v1 = vadd.f32 %v436_v63, %v417_v61 }
 0x12d   :  { %v376_v58 = vpop.f32.mrf.mxu2  ;;  %v396_v59 = vpop.f32.mrf.mxu3 }
 0x12e   :  { %v377_v60 = vadd.f32 %v376_v58, %v357_v55 }
 0x130   :  { %v397_v62 = vadd.f32 %v396_v59, %v377_v60 }
 0x132   :  { %v479_v0 = vmax.f32 %v397_v62, 0.0 }
 0x134   :  { %533 = vmatmul.f32.vlgmr.msrb.gmra.mxu0 %v479_v0 }
 0x135   :  { %v456_v2 = vpop.f32.mrf.mxu2  ;;  %v476_v4 = vpop.f32.mrf.mxu3 }
 0x136   :  { %v457_v3 = vadd.f32 %v456_v2, %v437_v1 }
 0x138   :  { %v477_v5 = vadd.f32 %v476_v4, %v457_v3 }
 0x13a   :  { %v480_v6 = vmax.f32 %v477_v5, 0.0 }
 0x13c   :  { %553 = vmatmul.f32.vlgmr.msrb.gmra.mxu1 %v480_v6 }
 0x1b1   :  { %v534_v8 = vpop.f32.mrf.mxu0 }
 0x1b2   :  { %v535_v9 = vadd.f32 %v583_v7, %v534_v8 }
 0x1b9   :  { %v554_v10 = vpop.f32.mrf.mxu1 }
 0x1ba   :  { %v555_v11 = vadd.f32 %v554_v10, %v535_v9 }
 0x1bc   :  { %v582_v12 = vmul.f32 -1.442695, %v555_v11 }
 0x1be   :  { %584 = vpow2.f32 %v582_v12 }
 0x1c4   :  { %v585_v13 = vpop.eup %584 }
 0x1c5   :  { %v560_v14 = vadd.f32 1.0, %v585_v13 }
 0x1c7   :  { %586 = vrcp.f32 %v560_v14  ;;  %v572_v18 = vand.u32 2147483648, %v560_v14  ;;  %v570_v20 = vand.u32 2147483647, %v560_v14  ;;  %vm566_vm1 = vweird.f32 %v560_v14 }
 0x1c9   :  { %v573_v22 = vor.u32 1.1754944e-38, %v572_v18  ;;  %vm571_vm4 = vcmp.eq.f32.partialorder %v570_v20, 8.507059e+37 }
 0x1cd   :  { %v587_v15 = vpop.eup %586 }
 0x1ce   :  { %v562_v16 = vmul.f32 %v587_v15, %v560_v14  ;;  %vm567_vm0 = vweird.f32 %v587_v15 }
 0x1cf   :  { %vm568_vm2 = vmor %vm566_vm1, %vm567_vm0 }
 0x1d0   :  { %v563_v17 = vsub.f32 1.0, %v562_v16 }
 0x1d2   :  { %v564_v19 = vmul.f32 %v587_v15, %v563_v17 }
 0x1d4   :  { %v565_v21 = vadd.f32 %v587_v15, %v564_v19 }
 0x1d6   :  { %v569_v23 = vsel %vm568_vm2, %v587_v15, %v565_v21 }
 0x1d7   :  { %v574_v24 = vsel %vm571_vm4, %v573_v22, %v569_v23 }
 0x1d8   :  { %577 = vst.msk [vmem:[%s1322_s7] sm:$0xff] %vm576_vm3, %v574_v24 }

</bundles_post_ra>
